<compile_context>
chip_gen: v5e
topology: v5e:2x2
jax: 0.10.0
libtpu: 0.0.40
codegen_flags: <defaults>
</compile_context>

<pallas_src>
import functools
from itertools import product

import numpy as np
import jax
import jax.numpy as jnp
from jax.experimental import pallas as pl
from jax.experimental.pallas import tpu as pltpu


def make_order_mat(d, order):
    """All multi-indices alpha in N^d with |alpha| <= order (deterministic order)."""
    idx = [a for a in product(range(order + 1), repeat=d) if sum(a) <= order]
    idx.sort(key=lambda a: (sum(a), a))
    return np.asarray(idx, dtype=np.int32)  # [P, d]


def pce_loss_kernel(xt_ref, mu_ref, ct_ref, loss_ref,
                    acc_yp, acc_yp2, acc_c, *, order_mat, order, n_real):
    # xt_ref: (d, TILE_N)  mu_ref: (d, 1)  ct_ref: (P, TILE_N)  loss_ref: (1, 1)
    # acc_yp/acc_yp2: (1, 1) f32 scratch  acc_c: (P, 1) f32 scratch
    i = pl.program_id(0)
    P, d = order_mat.shape
    K = order + 1

    @pl.when(i == 0)
    def _init():
        acc_yp[...] = jnp.zeros_like(acc_yp)
        acc_yp2[...] = jnp.zeros_like(acc_yp2)
        acc_c[...] = jnp.zeros_like(acc_c)

    # Upcast immediately after load; all arithmetic in f32 (v5e has no bf16 VPU).
    z = xt_ref[...].astype(jnp.float32) - mu_ref[...]      # (d, TILE_N)
    ct = ct_ref[...].astype(jnp.float32)                   # (P, TILE_N)

    # Probabilists' Hermite recurrence over the whole (d, TILE_N) tile (pure VPU).
    hes = [jnp.ones_like(z)]                               # He_0 = 1
    if K > 1:
        hes.append(z)                                      # He_1 = z
    for k in range(2, K):                                  # He_k = z*He_{k-1} - (k-1)*He_{k-2}
        hes.append(z * hes[k - 1] - float(k - 1) * hes[k - 2])

    # y_pred via static trace-time degree selection from order_mat (no one-hot
    # matmul, no MXU).  Per-p / per-dim selection is a cheap sublane slice.
    def p_term(p):
        term = ct[p:p + 1, :]                              # (1, TILE_N)
        for j in range(d):
            k = int(order_mat[p, j])
            if k > 0:                                      # He_0 == 1 -> skip
                term = term * hes[k][j:j + 1, :]
        return term

    yp = p_term(0)
    for p in range(1, P):
        yp = yp + p_term(p)                                # (1, TILE_N)

    # Streaming accumulators (padded columns have c == 0 => yp == 0 => no effect).
    acc_yp[...] += jnp.sum(yp, axis=1, keepdims=True)
    acc_yp2[...] += jnp.sum(yp * yp, axis=1, keepdims=True)
    acc_c[...] += jnp.sum(ct, axis=1, keepdims=True)

    @pl.when(i == pl.num_programs(0) - 1)
    def _finalize():
        n = float(n_real)
        yp_mean = acc_yp[...] / n                                   # (1, 1)
        # torch.Tensor.var() default is unbiased (ddof = 1); one-pass formula.
        yp_var = (acc_yp2[...] - n * yp_mean * yp_mean) / (n - 1.0)
        c_mean = acc_c[...] / n                                     # (P, 1)
        c0 = c_mean[0:1, 0:1]                                       # (1, 1)
        if P > 2:
            # torch: c_mean[1:-1] (excludes first AND last coefficient)
            c_inter_sq = jnp.sum(c_mean[1:P - 1, :] ** 2, keepdims=True)
        else:
            c_inter_sq = jnp.zeros((1, 1), jnp.float32)
        loss_ref[...] = jnp.abs(c0 - yp_mean) + jnp.abs(c_inter_sq - yp_var)


def coefficient_pce_loss(x_coeff, c, mu, order_mat, order, *, tile_n=4096):
    """Pallas wrapper reproducing CoefficientPCELoss.forward."""
    N, d = x_coeff.shape
    P = c.shape[1]
    order_mat = np.asarray(order_mat, dtype=np.int32)
    assert order_mat.shape == (P, d)

    # Lane-dense transposed layout: put N on the lane (last) axis.
    xt = jnp.transpose(x_coeff)                            # (d, N)
    ct = jnp.transpose(c)                                  # (P, N)
    mu2d = jnp.asarray(mu, dtype=jnp.float32).reshape(d, 1)

    # Tile size: multiple of 128 lanes, capped so double-buffered blocks stay
    # well under the v7x 64 MiB VMEM budget (x + c blocks, 2 buffers each).
    tile_n = max(128, (int(tile_n) // 128) * 128)
    tile_n = min(tile_n, pl.cdiv(N, 128) * 128)
    n_pad = pl.cdiv(N, tile_n) * tile_n
    if n_pad != N:
        # Zero-padded c columns contribute 0 to every accumulated sum -> exact.
        xt = jnp.pad(xt, ((0, 0), (0, n_pad - N)))
        ct = jnp.pad(ct, ((0, 0), (0, n_pad - N)))
    num_tiles = n_pad // tile_n

    kernel = functools.partial(pce_loss_kernel,
                               order_mat=order_mat, order=order, n_real=N)

    return pl.pallas_call(
        kernel,
        out_shape=jax.ShapeDtypeStruct((1, 1), jnp.float32),
        grid_spec=pltpu.PrefetchScalarGridSpec(
            num_scalar_prefetch=0,
            grid=(num_tiles,),
            in_specs=[
                pl.BlockSpec((d, tile_n), lambda i: (0, i)),   # x (transposed)
                pl.BlockSpec((d, 1), lambda i: (0, 0)),        # mu
                pl.BlockSpec((P, tile_n), lambda i: (0, i)),   # c (transposed)
            ],
            out_specs=pl.BlockSpec((1, 1), lambda i: (0, 0)),
            scratch_shapes=[
                pltpu.VMEM((1, 1), jnp.float32),               # sum(yp)
                pltpu.VMEM((1, 1), jnp.float32),               # sum(yp^2)
                pltpu.VMEM((P, 1), jnp.float32),               # sum(c) per coeff
            ]),
        compiler_params=pltpu.CompilerParams(
            dimension_semantics=("arbitrary",),                # N axis is a reduction
            vmem_limit_bytes=32 * 1024 * 1024),                # v7x-safe budget
    )(xt, mu2d, ct)


def reference_loss(x_coeff, c, mu, order_mat, order):
    """Pure numpy reference of the forward pass (same PCE convention)."""
    x = np.asarray(x_coeff, np.float64)
    cc = np.asarray(c, np.float64)
    m = np.asarray(mu, np.float64)
    z = x - m[None, :]
    N, d = x.shape
    P = cc.shape[1]
    K = order + 1
    H = np.zeros((N, d, K))
    H[:, :, 0] = 1.0
    if K > 1:
        H[:, :, 1] = z
    for k in range(2, K):
        H[:, :, k] = z * H[:, :, k - 1] - (k - 1) * H[:, :, k - 2]
    psi = np.ones((N, P))
    for p in range(P):
        for j in range(d):
            psi[:, p] *= H[:, j, order_mat[p, j]]
    yp = np.sum(psi * cc, axis=1)
    c_mean = cc.mean(axis=0)
    return (abs(c_mean[0] - yp.mean())
            + abs(np.sum(c_mean[1:-1] ** 2) - yp.var(ddof=1)))


if __name__ == "__main__":
    # Small, deterministic problem: N samples, d stochastic dims, order-2 PCE.
    N, d, order = 8, 3, 2
    order_mat = make_order_mat(d, order)     # (P, d), P = C(d+order, order) = 10
    P = order_mat.shape[0]

    key = jax.random.PRNGKey(0)
    kx, kc, km = jax.random.split(key, 3)
    x_coeff = jax.random.normal(kx, (N, d), dtype=jnp.float32)
    c = 0.5 * jax.random.normal(kc, (N, P), dtype=jnp.float32)
    mu = 0.1 * jax.random.normal(km, (d,), dtype=jnp.float32)

    loss = coefficient_pce_loss(x_coeff, c, mu, order_mat, order)
    loss = jax.block_until_ready(loss)

    ref = reference_loss(np.asarray(x_coeff), np.asarray(c), np.asarray(mu),
                         order_mat, order)
    assert np.allclose(np.asarray(loss)[0, 0], ref, rtol=1e-4, atol=1e-5), (
        f"mismatch: pallas={np.asarray(loss)[0, 0]} ref={ref}")

    print("KERNEL_OK")
</pallas_src>

<mosaic_0001>
module attributes {stable_mosaic.version = 11 : i64} {
  func.func @pce_loss_kernel(%arg0: i32, %arg1: memref<3x128xf32, #tpu.memory_space<vmem>>, %arg2: memref<3x1xf32, #tpu.memory_space<vmem>>, %arg3: memref<10x128xf32, #tpu.memory_space<vmem>>, %arg4: memref<1x1xf32, #tpu.memory_space<vmem>>, %arg5: memref<1x1xf32, #tpu.memory_space<vmem>>, %arg6: memref<1x1xf32, #tpu.memory_space<vmem>>, %arg7: memref<10x1xf32, #tpu.memory_space<vmem>>) attributes {dimension_semantics = [#tpu.dimension_semantics<arbitrary>], iteration_bounds = array<i64: 1>, scalar_prefetch = 0 : i64, scratch_operands = 3 : i64, tpu.core_type = #tpu.core_type<tc>, window_params = [{transform_indices = @transform_0, window_bounds = array<i64: 3, 128>}, {pipeline_mode = #tpu.pipeline_mode<synchronous>, transform_indices = @transform_1, window_bounds = array<i64: 3, 1>}, {transform_indices = @transform_2, window_bounds = array<i64: 10, 128>}, {pipeline_mode = #tpu.pipeline_mode<synchronous>, transform_indices = @transform_3, window_bounds = array<i64: 1, 1>}]} {
    %c0_i32 = arith.constant 0 : i32
    %0 = arith.cmpi eq, %arg0, %c0_i32 : i32
    %1 = arith.extui %0 : i1 to i32
    %c0_i32_0 = arith.constant 0 : i32
    %2 = arith.cmpi ne, %1, %c0_i32_0 : i32
    scf.if %2 {
      %cst_24 = arith.constant 0.000000e+00 : f32
      %75 = vector.broadcast %cst_24 : f32 to vector<1x1xf32>
      %c0_25 = arith.constant 0 : index
      %c0_26 = arith.constant 0 : index
      %76 = vector.load %arg5[%c0_25, %c0_26] : memref<1x1xf32, #tpu.memory_space<vmem>>, vector<1x1xf32>
      tpu.vector_store %arg5[%c0_25, %c0_26], %75 {strides = array<i32>} : memref<1x1xf32, #tpu.memory_space<vmem>>, vector<1x1xf32>,
      %cst_27 = arith.constant 0.000000e+00 : f32
      %77 = vector.broadcast %cst_27 : f32 to vector<1x1xf32>
      %c0_28 = arith.constant 0 : index
      %c0_29 = arith.constant 0 : index
      %78 = vector.load %arg6[%c0_28, %c0_29] : memref<1x1xf32, #tpu.memory_space<vmem>>, vector<1x1xf32>
      tpu.vector_store %arg6[%c0_28, %c0_29], %77 {strides = array<i32>} : memref<1x1xf32, #tpu.memory_space<vmem>>, vector<1x1xf32>,
      %cst_30 = arith.constant 0.000000e+00 : f32
      %79 = vector.broadcast %cst_30 : f32 to vector<10x1xf32>
      %c0_31 = arith.constant 0 : index
      %c0_32 = arith.constant 0 : index
      %80 = vector.load %arg7[%c0_31, %c0_32] : memref<10x1xf32, #tpu.memory_space<vmem>>, vector<10x1xf32>
      tpu.vector_store %arg7[%c0_31, %c0_32], %79 {strides = array<i32>} : memref<10x1xf32, #tpu.memory_space<vmem>>, vector<10x1xf32>,
    } else {
    }
    %c0 = arith.constant 0 : index
    %c0_1 = arith.constant 0 : index
    %3 = vector.load %arg1[%c0, %c0_1] : memref<3x128xf32, #tpu.memory_space<vmem>>, vector<3x128xf32>
    %c0_2 = arith.constant 0 : index
    %c0_3 = arith.constant 0 : index
    %4 = vector.load %arg2[%c0_2, %c0_3] : memref<3x1xf32, #tpu.memory_space<vmem>>, vector<3x1xf32>
    %5 = vector.broadcast %4 : vector<3x1xf32> to vector<3x128xf32>
    %6 = arith.subf %3, %5 : vector<3x128xf32>
    %c0_4 = arith.constant 0 : index
    %c0_5 = arith.constant 0 : index
    %7 = vector.load %arg3[%c0_4, %c0_5] : memref<10x128xf32, #tpu.memory_space<vmem>>, vector<10x128xf32>
    %cst = arith.constant 1.000000e+00 : f32
    %8 = vector.broadcast %cst : f32 to vector<3x128xf32>
    %9 = arith.mulf %6, %6 : vector<3x128xf32>
    %cst_6 = arith.constant 1.000000e+00 : f32
    %10 = vector.broadcast %cst_6 : f32 to vector<3x128xf32>
    %11 = arith.mulf %10, %8 : vector<3x128xf32>
    %12 = arith.subf %9, %11 : vector<3x128xf32>
    %13 = vector.extract_strided_slice %7 {offsets = [0, 0], sizes = [1, 128], strides = [1, 1]} : vector<10x128xf32> to vector<1x128xf32>
    %14 = vector.extract_strided_slice %7 {offsets = [1, 0], sizes = [1, 128], strides = [1, 1]} : vector<10x128xf32> to vector<1x128xf32>
    %15 = vector.extract_strided_slice %6 {offsets = [2, 0], sizes = [1, 128], strides = [1, 1]} : vector<3x128xf32> to vector<1x128xf32>
    %16 = arith.mulf %14, %15 : vector<1x128xf32>
    %17 = arith.addf %13, %16 : vector<1x128xf32>
    %18 = vector.extract_strided_slice %7 {offsets = [2, 0], sizes = [1, 128], strides = [1, 1]} : vector<10x128xf32> to vector<1x128xf32>
    %19 = vector.extract_strided_slice %6 {offsets = [1, 0], sizes = [1, 128], strides = [1, 1]} : vector<3x128xf32> to vector<1x128xf32>
    %20 = arith.mulf %18, %19 : vector<1x128xf32>
    %21 = arith.addf %17, %20 : vector<1x128xf32>
    %22 = vector.extract_strided_slice %7 {offsets = [3, 0], sizes = [1, 128], strides = [1, 1]} : vector<10x128xf32> to vector<1x128xf32>
    %23 = vector.extract_strided_slice %6 {offsets = [0, 0], sizes = [1, 128], strides = [1, 1]} : vector<3x128xf32> to vector<1x128xf32>
    %24 = arith.mulf %22, %23 : vector<1x128xf32>
    %25 = arith.addf %21, %24 : vector<1x128xf32>
    %26 = vector.extract_strided_slice %7 {offsets = [4, 0], sizes = [1, 128], strides = [1, 1]} : vector<10x128xf32> to vector<1x128xf32>
    %27 = vector.extract_strided_slice %12 {offsets = [2, 0], sizes = [1, 128], strides = [1, 1]} : vector<3x128xf32> to vector<1x128xf32>
    %28 = arith.mulf %26, %27 : vector<1x128xf32>
    %29 = arith.addf %25, %28 : vector<1x128xf32>
    %30 = vector.extract_strided_slice %7 {offsets = [5, 0], sizes = [1, 128], strides = [1, 1]} : vector<10x128xf32> to vector<1x128xf32>
    %31 = vector.extract_strided_slice %6 {offsets = [1, 0], sizes = [1, 128], strides = [1, 1]} : vector<3x128xf32> to vector<1x128xf32>
    %32 = arith.mulf %30, %31 : vector<1x128xf32>
    %33 = vector.extract_strided_slice %6 {offsets = [2, 0], sizes = [1, 128], strides = [1, 1]} : vector<3x128xf32> to vector<1x128xf32>
    %34 = arith.mulf %32, %33 : vector<1x128xf32>
    %35 = arith.addf %29, %34 : vector<1x128xf32>
    %36 = vector.extract_strided_slice %7 {offsets = [6, 0], sizes = [1, 128], strides = [1, 1]} : vector<10x128xf32> to vector<1x128xf32>
    %37 = vector.extract_strided_slice %12 {offsets = [1, 0], sizes = [1, 128], strides = [1, 1]} : vector<3x128xf32> to vector<1x128xf32>
    %38 = arith.mulf %36, %37 : vector<1x128xf32>
    %39 = arith.addf %35, %38 : vector<1x128xf32>
    %40 = vector.extract_strided_slice %7 {offsets = [7, 0], sizes = [1, 128], strides = [1, 1]} : vector<10x128xf32> to vector<1x128xf32>
    %41 = vector.extract_strided_slice %6 {offsets = [0, 0], sizes = [1, 128], strides = [1, 1]} : vector<3x128xf32> to vector<1x128xf32>
    %42 = arith.mulf %40, %41 : vector<1x128xf32>
    %43 = vector.extract_strided_slice %6 {offsets = [2, 0], sizes = [1, 128], strides = [1, 1]} : vector<3x128xf32> to vector<1x128xf32>
    %44 = arith.mulf %42, %43 : vector<1x128xf32>
    %45 = arith.addf %39, %44 : vector<1x128xf32>
    %46 = vector.extract_strided_slice %7 {offsets = [8, 0], sizes = [1, 128], strides = [1, 1]} : vector<10x128xf32> to vector<1x128xf32>
    %47 = vector.extract_strided_slice %6 {offsets = [0, 0], sizes = [1, 128], strides = [1, 1]} : vector<3x128xf32> to vector<1x128xf32>
    %48 = arith.mulf %46, %47 : vector<1x128xf32>
    %49 = vector.extract_strided_slice %6 {offsets = [1, 0], sizes = [1, 128], strides = [1, 1]} : vector<3x128xf32> to vector<1x128xf32>
    %50 = arith.mulf %48, %49 : vector<1x128xf32>
    %51 = arith.addf %45, %50 : vector<1x128xf32>
    %52 = vector.extract_strided_slice %7 {offsets = [9, 0], sizes = [1, 128], strides = [1, 1]} : vector<10x128xf32> to vector<1x128xf32>
    %53 = vector.extract_strided_slice %12 {offsets = [0, 0], sizes = [1, 128], strides = [1, 1]} : vector<3x128xf32> to vector<1x128xf32>
    %54 = arith.mulf %52, %53 : vector<1x128xf32>
    %55 = arith.addf %51, %54 : vector<1x128xf32>
    %c0_7 = arith.constant 0 : index
    %c0_8 = arith.constant 0 : index
    %56 = vector.load %arg5[%c0_7, %c0_8] : memref<1x1xf32, #tpu.memory_space<vmem>>, vector<1x1xf32>
    %cst_9 = arith.constant dense<0.000000e+00> : vector<1xf32>
    %57 = vector.multi_reduction <add>, %55, %cst_9 [1] : vector<1x128xf32> to vector<1xf32>
    %58 = vector.shape_cast %57 : vector<1xf32> to vector<1x1xf32>
    %59 = arith.addf %56, %58 : vector<1x1xf32>
    %c0_10 = arith.constant 0 : index
    %c0_11 = arith.constant 0 : index
    %60 = vector.load %arg5[%c0_10, %c0_11] : memref<1x1xf32, #tpu.memory_space<vmem>>, vector<1x1xf32>
    tpu.vector_store %arg5[%c0_10, %c0_11], %59 {strides = array<i32>} : memref<1x1xf32, #tpu.memory_space<vmem>>, vector<1x1xf32>,
    %c0_12 = arith.constant 0 : index
    %c0_13 = arith.constant 0 : index
    %61 = vector.load %arg6[%c0_12, %c0_13] : memref<1x1xf32, #tpu.memory_space<vmem>>, vector<1x1xf32>
    %62 = arith.mulf %55, %55 : vector<1x128xf32>
    %cst_14 = arith.constant dense<0.000000e+00> : vector<1xf32>
    %63 = vector.multi_reduction <add>, %62, %cst_14 [1] : vector<1x128xf32> to vector<1xf32>
    %64 = vector.shape_cast %63 : vector<1xf32> to vector<1x1xf32>
    %65 = arith.addf %61, %64 : vector<1x1xf32>
    %c0_15 = arith.constant 0 : index
    %c0_16 = arith.constant 0 : index
    %66 = vector.load %arg6[%c0_15, %c0_16] : memref<1x1xf32, #tpu.memory_space<vmem>>, vector<1x1xf32>
    tpu.vector_store %arg6[%c0_15, %c0_16], %65 {strides = array<i32>} : memref<1x1xf32, #tpu.memory_space<vmem>>, vector<1x1xf32>,
    %c0_17 = arith.constant 0 : index
    %c0_18 = arith.constant 0 : index
    %67 = vector.load %arg7[%c0_17, %c0_18] : memref<10x1xf32, #tpu.memory_space<vmem>>, vector<10x1xf32>
    %cst_19 = arith.constant dense<0.000000e+00> : vector<10xf32>
    %68 = vector.multi_reduction <add>, %7, %cst_19 [1] : vector<10x128xf32> to vector<10xf32>
    %69 = vector.shape_cast %68 : vector<10xf32> to vector<10x1xf32>
    %70 = arith.addf %67, %69 : vector<10x1xf32>
    %c0_20 = arith.constant 0 : index
    %c0_21 = arith.constant 0 : index
    %71 = vector.load %arg7[%c0_20, %c0_21] : memref<10x1xf32, #tpu.memory_space<vmem>>, vector<10x1xf32>
    tpu.vector_store %arg7[%c0_20, %c0_21], %70 {strides = array<i32>} : memref<10x1xf32, #tpu.memory_space<vmem>>, vector<10x1xf32>,
    %c0_i32_22 = arith.constant 0 : i32
    %72 = arith.cmpi eq, %arg0, %c0_i32_22 : i32
    %73 = arith.extui %72 : i1 to i32
    %c0_i32_23 = arith.constant 0 : i32
    %74 = arith.cmpi ne, %73, %c0_i32_23 : i32
    scf.if %74 {
      %c0_24 = arith.constant 0 : index
      %c0_25 = arith.constant 0 : index
      %75 = vector.load %arg5[%c0_24, %c0_25] : memref<1x1xf32, #tpu.memory_space<vmem>>, vector<1x1xf32>
      %cst_26 = arith.constant 8.000000e+00 : f32
      %76 = vector.broadcast %cst_26 : f32 to vector<1x1xf32>
      %77 = arith.divf %75, %76 : vector<1x1xf32>
      %c0_27 = arith.constant 0 : index
      %c0_28 = arith.constant 0 : index
      %78 = vector.load %arg6[%c0_27, %c0_28] : memref<1x1xf32, #tpu.memory_space<vmem>>, vector<1x1xf32>
      %cst_29 = arith.constant 8.000000e+00 : f32
      %79 = vector.broadcast %cst_29 : f32 to vector<1x1xf32>
      %80 = arith.mulf %79, %77 : vector<1x1xf32>
      %81 = arith.mulf %80, %77 : vector<1x1xf32>
      %82 = arith.subf %78, %81 : vector<1x1xf32>
      %cst_30 = arith.constant 7.000000e+00 : f32
      %83 = vector.broadcast %cst_30 : f32 to vector<1x1xf32>
      %84 = arith.divf %82, %83 : vector<1x1xf32>
      %c0_31 = arith.constant 0 : index
      %c0_32 = arith.constant 0 : index
      %85 = vector.load %arg7[%c0_31, %c0_32] : memref<10x1xf32, #tpu.memory_space<vmem>>, vector<10x1xf32>
      %cst_33 = arith.constant 8.000000e+00 : f32
      %86 = vector.broadcast %cst_33 : f32 to vector<10x1xf32>
      %87 = arith.divf %85, %86 : vector<10x1xf32>
      %88 = vector.extract_strided_slice %87 {offsets = [0, 0], sizes = [1, 1], strides = [1, 1]} : vector<10x1xf32> to vector<1x1xf32>
      %89 = vector.extract_strided_slice %87 {offsets = [1, 0], sizes = [8, 1], strides = [1, 1]} : vector<10x1xf32> to vector<8x1xf32>
      %90 = arith.mulf %89, %89 : vector<8x1xf32>
      %91 = vector.shape_cast %90 : vector<8x1xf32> to vector<1x8x1xf32>
      %cst_34 = arith.constant dense<0.000000e+00> : vector<1xf32>
      %92 = vector.multi_reduction <add>, %91, %cst_34 [1, 2] : vector<1x8x1xf32> to vector<1xf32>
      %93 = vector.shape_cast %92 : vector<1xf32> to vector<1x1x1xf32>
      %94 = vector.extract %93[0, 0, 0] : f32 from vector<1x1x1xf32>
      %95 = vector.broadcast %94 : f32 to vector<1x1xf32>
      %96 = arith.subf %88, %77 : vector<1x1xf32>
      %97 = math.absf %96 : vector<1x1xf32>
      %98 = arith.subf %95, %84 : vector<1x1xf32>
      %99 = math.absf %98 : vector<1x1xf32>
      %100 = arith.addf %97, %99 : vector<1x1xf32>
      %c0_35 = arith.constant 0 : index
      %c0_36 = arith.constant 0 : index
      %101 = vector.load %arg4[%c0_35, %c0_36] : memref<1x1xf32, #tpu.memory_space<vmem>>, vector<1x1xf32>
      tpu.vector_store %arg4[%c0_35, %c0_36], %100 {strides = array<i32>} : memref<1x1xf32, #tpu.memory_space<vmem>>, vector<1x1xf32>,
    } else {
    }
    return
  }
  func.func @transform_0(%arg0: i32) -> (i32, i32) {
    %c0_i32 = arith.constant 0 : i32
    %c0_i32_0 = arith.constant 0 : i32
    return %c0_i32, %arg0 : i32, i32
  }
  func.func @transform_1(%arg0: i32) -> (i32, i32) {
    %c0_i32 = arith.constant 0 : i32
    %c0_i32_0 = arith.constant 0 : i32
    %c0_i32_1 = arith.constant 0 : i32
    return %c0_i32, %c0_i32_0 : i32, i32
  }
  func.func @transform_2(%arg0: i32) -> (i32, i32) {
    %c0_i32 = arith.constant 0 : i32
    %c0_i32_0 = arith.constant 0 : i32
    return %c0_i32, %arg0 : i32, i32
  }
  func.func @transform_3(%arg0: i32) -> (i32, i32) {
    %c0_i32 = arith.constant 0 : i32
    %c0_i32_0 = arith.constant 0 : i32
    %c0_i32_1 = arith.constant 0 : i32
    return %c0_i32, %c0_i32_0 : i32, i32
  }
}

</mosaic_0001>

<bundles_post_ra>
// kernel: tpu_custom_call.1
= control target key start
LH: loop header
LB: loop body
LE: loop exit
PB: predicated region body
PF: predicated region fallthrough
CT: control target
= control target key end

     0   :  { %8 = vsyncpa [#allocation6], 0  ;;  %s345_s0 = inlined_call_operand.vmem [shape: f32[3,128], index: 0, kind: input, shape index: {}]   ;;  %s346_s1 = inlined_call_operand.vmem [shape: f32[3,1], index: 1, kind: input, shape index: {}]   ;;  %s347_s2 = inlined_call_operand.hbm [shape: f32[10,128], index: 2, kind: input, shape index: {}]   ;;  %s348_s3 = inlined_call_operand.hbm [shape: f32[1,1], index: 3, kind: output, shape index: {}]  }
   0x1   :  { %9 = vsyncpa [#allocation7], 0  ;;  %s18_s14 = sshll.u32 %s347_s2, 4  ;;  %s285_s15 = smov [#allocation5]   ;;  %s19_s14 = int_to_ptr.hbm [resolvable:$true] %s18_s14 }
   0x2   :  { %s20_s16 = sshll.u32 %s285_s15, 4  ;;  %s286_s17 = smov 128   ;;  %s21_s16 = int_to_ptr.vmem [resolvable:$true] %s20_s16 }
   0x3   :  { %s287_s18 = smov 8  }
   0x4   :  { %26 = dma.hbm_to_vmem [thread:$0]  %s19_s14, 256, %s21_s16, [#allocation6], %s286_s17, %s286_s17, %s287_s18  }
   0x5   :  { %281 = dma.done.wait [#allocation6], 256  }
   0x6   :  { %282 = vsyncadd [#allocation6], 4294967040  ;;  %v288_v0 = vmov 0   ;;  %v50_v1 = vld [vmem:[#allocation5] sm:$0xff]  ;;  %v43_v2 = vld [vmem:[%s346_s1] sm:$0x7] }
   0x7   :  { %227 = vset.pattern.permute.xlu1 %v288_v0  ;;  %228 = vset.pattern.permute.xlu0 %v288_v0  ;;  %v319_v3 = vld [vmem:[#allocation5 + $0x8] sm:$0x3]  ;;  %vm135_vm0 = vcmask 1041408   ;;  %vm38_vm1 = vcmask 7168   ;;  %v289_v5 = vmov 0.0   ;;  %vm40_vm2 = vcmask 1024  }
   0x8   :  { %133 = vadd.xlane.f32.xlu0 %v50_v1  ;;  %46 = vperm.xlu1 %227, %v43_v2   ;;  %v136_v4 = vsel %vm135_vm0, %v319_v3, 0.0  ;;  %39 = vst.msk [vmem:[#allocation4] sm:$0xff] %vm38_vm1, %v289_v5  ;;  %v290_v6 = vmov 8.0   ;;  %v42_v9 = vld [vmem:[%s345_s0] sm:$0x7]  ;;  %vm35_vm3 = vcmask 0  }
   0x9   :  { %41 = vst.msk [vmem:[#allocation4 + $0x8] sm:$0x3] %vm40_vm2, %v289_v5  ;;  %229 = vrcp.f32 %v290_v6  ;;  %vm177_vm5 = vcmask 1046528   ;;  %vm117_vm6 = vcmask 1040384   ;;  %s292_s21 = smov [#allocation8]   ;;  %s206_s25 = sshll.u32 %s348_s3, 4  ;;  %s207_s25 = int_to_ptr.hbm [resolvable:$true] %s206_s25 }
   0xa   :  { %36 = vst.msk [vmem:[#allocation2] sm:$0x1] %vm35_vm3, %v289_v5  ;;  %s204_s22 = sshll.u32 %s292_s21, 4  ;;  %s205_s22 = int_to_ptr.vmem [resolvable:$true] %s204_s22 }
   0xb   :  { %37 = vst.msk [vmem:[#allocation3] sm:$0x1] %vm35_vm3, %v289_v5 }
   0xf   :  { %v230_v7 = vpop.eup %229  ;;  %v131_v10 = vld [vmem:[#allocation4] sm:$0xff] }
  0x10   :  { %137 = vadd.xlane.f32.xlu0 %v136_v4  ;;  %v150_v8 = vmul.f32 8.0, %v230_v7  ;;  %v132_v27 = vld [vmem:[#allocation4 + $0x8] sm:$0x3]  ;;  %vm154_vm4 = vweird.f32 %v230_v7 }
  0x12   :  { %v151_v12 = vsub.f32 1.0, %v150_v8 }
  0x14   :  { %v152_v21 = vmul.f32 %v230_v7, %v151_v12 }
  0x16   :  { %v153_v33 = vadd.f32 %v230_v7, %v152_v21 }
  0x18   :  { %v155_v43 = vsel %vm154_vm4, %v230_v7, %v153_v33 }
  0x7a   :  { %v47_v11 = vpop.permute.xlu1 %46 }
  0x7b   :  { %v49_v13 = vsub.f32 %v42_v9, %v47_v11  ;;  %v134_v14 = vpop.xlane.xlu0 %133  ;;  %v116_v9 = vld [vmem:[#allocation2] sm:$0x1] }
  0x7c   :  { %v139_v15 = vadd.f32 %v134_v14, %v131_v10 }
  0x7d   :  { %v52_v16 = vmul.f32 %v49_v13, %v49_v13  ;;  %v55_v17 = vrot.slane %v49_v13, 1  ;;  %v62_v18 = vrot.slane %v49_v13, 7  ;;  %v69_v19 = vrot.slane %v49_v13, 5 }
  0x7e   :  { %142 = vst.msk [vmem:[#allocation4] sm:$0xff] %vm38_vm1, %v139_v15  ;;  %v84_v20 = vrot.slane %v49_v13, 4  ;;  %v99_v32 = vrot.slane %v49_v13, 3  ;;  %v106_v51 = vmul.f32 %v319_v3, %v49_v13 }
  0x7f   :  { %v216_v22 = vadd.f32 -1.0, %v52_v16  ;;  %v57_v23 = vmul.f32 %v55_v17, %v50_v1  ;;  %v64_v24 = vmul.f32 %v62_v18, %v50_v1  ;;  %v71_v25 = vmul.f32 %v69_v19, %v50_v1  ;;  %v124_v16 = vld [vmem:[#allocation3] sm:$0x1] }
  0x80   :  { %v86_v26 = vmul.f32 %v84_v20, %v50_v1  ;;  %v107_v57 = vmul.f32 %v106_v51, %v55_v17 }
  0x81   :  { %v59_v28 = vrot.slane %v57_v23, 1  ;;  %v66_v29 = vrot.slane %v64_v24, 2  ;;  %v77_v30 = vrot.slane %v216_v22, 6  ;;  %v92_v31 = vrot.slane %v216_v22, 3 }
  0x82   :  { %v73_v36 = vrot.slane %v71_v25, 3  ;;  %v87_v38 = vmul.f32 %v86_v26, %v69_v19  ;;  %v101_v46 = vmul.f32 %v99_v32, %v57_v23  ;;  %v109_v47 = vrot.slane %v216_v22, 7 }
  0x83   :  { %v138_v34 = vpop.xlane.xlu0 %137  ;;  %v61_v35 = vadd.f32 %v59_v28, %v50_v1  ;;  %v79_v37 = vmul.f32 %v77_v30, %v50_v1  ;;  %v94_v42 = vmul.f32 %v92_v31, %v50_v1  ;;  %v291_v22 = vmov 7.0  }
  0x84   :  { %v140_v39 = vadd.f32 %v138_v34, %v132_v27  ;;  %v89_v45 = vrot.slane %v87_v38, 5  ;;  %v103_v54 = vrot.slane %v101_v46, 7  ;;  %v111_v55 = vmul.f32 %v109_v47, %v319_v3 }
  0x85   :  { %v68_v40 = vadd.f32 %v66_v29, %v61_v35  ;;  %v81_v41 = vrot.slane %v79_v37, 4  ;;  %v169_v48 = vld [vmem:[#allocation4] sm:$0xff]  ;;  %v96_v50 = vrot.slane %v94_v42, 6  ;;  %231 = vrcp.f32 %v291_v22 }
  0x86   :  { %144 = vst.msk [vmem:[#allocation4 + $0x8] sm:$0x3] %vm40_vm2, %v140_v39  ;;  %v332_v52 = vmul.f32 %v169_v48, %v155_v43  ;;  %v113_v62 = vrot.slane %v111_v55, 1 }
  0x87   :  { %v75_v44 = vadd.f32 %v73_v36, %v68_v40 }
  0x88   :  { %v173_v60 = vmul.f32 %v332_v52, %v332_v52 }
  0x89   :  { %v83_v49 = vadd.f32 %v81_v41, %v75_v44 }
  0x8a   :  { %v178_v1 = vrot.slane %v173_v60, 1 }
  0x8b   :  { %v91_v53 = vadd.f32 %v89_v45, %v83_v49  ;;  %v232_v23 = vpop.eup %231 }
  0x8c   :  { %v162_v24 = vmul.f32 7.0, %v232_v23  ;;  %vm166_vm7 = vweird.f32 %v232_v23 }
  0x8d   :  { %v98_v56 = vadd.f32 %v96_v50, %v91_v53  ;;  %v170_v58 = vld [vmem:[#allocation4 + $0x8] sm:$0x3] }
  0x8e   :  { %v172_v59 = vmul.f32 %v170_v58, %v155_v43  ;;  %v163_v26 = vsub.f32 1.0, %v162_v24 }
  0x8f   :  { %v105_v61 = vadd.f32 %v103_v54, %v98_v56 }
  0x90   :  { %v174_v63 = vmul.f32 %v172_v59, %v172_v59  ;;  %v164_v29 = vmul.f32 %v232_v23, %v163_v26 }
  0x91   :  { %v108_v0 = vadd.f32 %v107_v57, %v105_v61 }
  0x92   :  { %v179_v2 = vrot.slane %v174_v63, 1  ;;  %v165_v32 = vadd.f32 %v232_v23, %v164_v29 }
  0x93   :  { %v115_v4 = vadd.f32 %v113_v62, %v108_v0 }
  0x94   :  { %v180_v5 = vsel %vm177_vm5, %v178_v1, %v179_v2  ;;  %v167_v34 = vsel %vm166_vm7, %v232_v23, %v165_v32 }
  0x95   :  { %v118_v6 = vsel %vm117_vm6, %v115_v4, 0.0  ;;  %v182_v3 = vsel %vm38_vm1, %v180_v5, 0.0  ;;  %v125_v7 = vmul.f32 %v115_v4, %v115_v4 }
  0x96   :  { %119 = vadd.xlane.f32.xlu2 %v118_v6  ;;  %183 = vadd.xlane.f32.xlu1 %v182_v3 }
  0x97   :  { %v126_v8 = vsel %vm117_vm6, %v125_v7, 0.0 }
  0x9e   :  { %127 = vadd.xlane.f32.xlu2 %v126_v8 }
 0x109   :  { %v120_v10 = vpop.xlane.xlu2 %119  ;;  %v184_v11 = vpop.xlane.xlu1 %183 }
 0x10a   :  { %v121_v12 = vadd.f32 %v120_v10, %v116_v9  ;;  %v185_v13 = vrot.slane %v184_v11, 4 }
 0x10c   :  { %123 = vst.msk [vmem:[#allocation2] sm:$0x1] %vm35_vm3, %v121_v12  ;;  %v186_v14 = vadd.f32 %v185_v13, %v184_v11 }
 0x10e   :  { %v187_v15 = vrot.slane %v186_v14, 2 }
 0x110   :  { %v188_v17 = vadd.f32 %v187_v15, %v186_v14 }
 0x111   :  { %v128_v18 = vpop.xlane.xlu2 %127 }
 0x112   :  { %v189_v19 = vrot.slane %v188_v17, 1  ;;  %v129_v20 = vadd.f32 %v128_v18, %v124_v16 }
 0x113   :  { %v148_v25 = vld [vmem:[#allocation2] sm:$0x1] }
 0x114   :  { %v190_v21 = vadd.f32 %v189_v19, %v188_v17  ;;  %130 = vst.msk [vmem:[#allocation3] sm:$0x1] %vm35_vm3, %v129_v20  ;;  %v156_v27 = vmul.f32 %v155_v43, %v148_v25 }
 0x116   :  { %217 = vpush %v190_v21  ;;  %v158_v28 = vmul.f32 8.0, %v156_v27  ;;  %v193_v36 = vsub.f32 %v332_v52, %v156_v27 }
 0x118   :  { %v159_v30 = vmul.f32 %v158_v28, %v156_v27  ;;  %v194_v39 = vand.u32 2147483647, %v193_v36 }
 0x11b   :  { %v157_v31 = vld [vmem:[#allocation3] sm:$0x1] }
 0x11c   :  { %v160_v33 = vsub.f32 %v157_v31, %v159_v30 }
 0x11e   :  { %v168_v35 = vmul.f32 %v167_v34, %v160_v33 }
 0x147   :  { %s218_s0 = spop %217 }
 0x148   :  { %v192_v37 = vstv %s218_s0 }
 0x149   :  { %v195_v38 = vsub.f32 %v192_v37, %v168_v35 }
 0x14b   :  { %v196_v40 = vand.u32 2147483647, %v195_v38 }
 0x14d   :  { %v197_v41 = vadd.f32 %v196_v40, %v194_v39 }
 0x14f   :  { %198 = vst.msk [vmem:[#allocation8] sm:$0x1] %vm35_vm3, %v197_v41 }
 0x150   :  { %209 = dma.vmem_to_hbm [thread:$0]  %s205_s22, 16, %s207_s25, [#allocation7]  }
 0x151   :  { %283 = dma.done.wait [#allocation7], 16  }
 0x152   :  { %284 = vsyncadd [#allocation7], 4294967280 }
 0x153   :  { %214 = vsyncpa [#allocation6], 1 }
 0x154   :  { %215 = vsyncpa [#allocation7], 1 }

</bundles_post_ra>
